<compile_context>
chip_gen: v5e
topology: v5e:2x2
jax: 0.10.0
libtpu: 0.0.40
codegen_flags: <defaults>
</compile_context>

<pallas_src>
import jax
import jax.numpy as jnp
from jax.experimental import pallas as pl
from jax.experimental.pallas import tpu as pltpu

# Logical (PyTorch) sizes
N_STATES = 4     # CartPole observation dim
N_ACTIONS = 2    # CartPole action dim
HIDDEN = 50

# Padded (TPU) sizes
K1 = 8                  # padded input width: 4 features + 1 ones-column + 3 zeros
H_PAD = 128             # padded hidden width (lane-dense)
A_PAD = 128             # padded action width (lane-dense output => unmasked vst)
ONE_COL = N_STATES      # column of x_aug holding the constant 1.0 (bias-1 path)
BIAS2_COL = HIDDEN      # padded hidden column forced to 1.0 (bias-2 path)
W_ROWS = K1 + H_PAD     # 136: packed [W1_aug ; W2_aug] slab rows

# Cap batch block so double-buffered blocks fit comfortably in v7x's 64 MiB VMEM.
MAX_BLOCK_B = 1024


def net_kernel(x_ref, w_ref, o_ref):
    # x_ref:  (block_B, K1)        f32
    # w_ref:  (W_ROWS, A_PAD)      f32  -- per-net [W1_aug ; W2_aug] slab (net dim squeezed)
    # o_ref:  (block_B, A_PAD)     f32  -- lane-dense (unmasked stores)
    x = x_ref[...]
    w1 = w_ref[pl.ds(0, K1), :]        # (8, 128)   tile-aligned static view
    w2 = w_ref[pl.ds(K1, H_PAD), :]    # (128, 128) tile-aligned static view

    # fc1 + bias (bias rides in row ONE_COL of w1) + ReLU
    h = jnp.maximum(jnp.dot(x, w1, preferred_element_type=jnp.float32), 0.0)
    # h[:, BIAS2_COL] == 1.0 for real rows, so row BIAS2_COL of w2 adds b2.
    o_ref[...] = jnp.dot(h, w2, preferred_element_type=jnp.float32)


def pack_params(w1, b1, w2, b2):
    """Pack PyTorch-layout params into one padded (W_ROWS, A_PAD) f32 slab.

    w1: (HIDDEN, N_STATES), b1: (HIDDEN,), w2: (N_ACTIONS, HIDDEN), b2: (N_ACTIONS,)
    """
    w1_aug = jnp.zeros((K1, H_PAD), jnp.float32)
    w1_aug = w1_aug.at[:N_STATES, :HIDDEN].set(w1.T.astype(jnp.float32))
    w1_aug = w1_aug.at[ONE_COL, :HIDDEN].set(b1.astype(jnp.float32))
    # Route a constant 1.0 into hidden column BIAS2_COL (ReLU(1)=1) so the
    # second layer's bias can live in the weight slab too.
    w1_aug = w1_aug.at[ONE_COL, BIAS2_COL].set(1.0)

    w2_aug = jnp.zeros((H_PAD, A_PAD), jnp.float32)
    w2_aug = w2_aug.at[:HIDDEN, :N_ACTIONS].set(w2.T.astype(jnp.float32))
    w2_aug = w2_aug.at[BIAS2_COL, :N_ACTIONS].set(b2.astype(jnp.float32))

    return jnp.concatenate([w1_aug, w2_aug], axis=0)  # (136, 128)


@jax.jit
def net_forward_multi(x, w_slabs):
    """Evaluate several packed networks on the same batch in ONE pallas_call.

    x:       (B, N_STATES) f32
    w_slabs: (N_NETS, W_ROWS, A_PAD) f32  (e.g. stacked eval_net + target_net)
    returns: (N_NETS, B, N_ACTIONS) f32
    """
    n_nets = w_slabs.shape[0]
    B = x.shape[0]

    # Batch blocking: multiple of 8 sublanes, capped for v7x VMEM headroom.
    block_b = min(MAX_BLOCK_B, max(8, ((B + 7) // 8) * 8))
    b_pad = ((B + block_b - 1) // block_b) * block_b
    nb = b_pad // block_b

    # Zero-padded, sublane-aligned input with a ones column for the fc1 bias.
    # Padded batch rows stay all-zero (no ones column) so they produce zeros.
    x_aug = jnp.zeros((b_pad, K1), jnp.float32)
    x_aug = x_aug.at[:B, :N_STATES].set(x.astype(jnp.float32))
    x_aug = x_aug.at[:B, ONE_COL].set(1.0)

    out_pad = pl.pallas_call(
        net_kernel,
        out_shape=jax.ShapeDtypeStruct((n_nets, b_pad, A_PAD), jnp.float32),
        grid=(n_nets, nb),
        in_specs=[
            pl.BlockSpec((block_b, K1), lambda n, b: (b, 0)),
            pl.BlockSpec((None, W_ROWS, A_PAD), lambda n, b: (n, 0, 0)),
        ],
        out_specs=pl.BlockSpec((None, block_b, A_PAD), lambda n, b: (n, b, 0)),
        compiler_params=pltpu.CompilerParams(
            dimension_semantics=("parallel", "parallel")),
    )(x_aug, w_slabs)

    return out_pad[:, :B, :N_ACTIONS]


@jax.jit
def net_forward(x, w_slab):
    """Single-network convenience wrapper: x (B, N_STATES) -> (B, N_ACTIONS)."""
    return net_forward_multi(x, w_slab[None])[0]


def init_params(key):
    k1, k2, k3, k4 = jax.random.split(key, 4)
    # PyTorch: weight.data.normal_(0, 0.1); biases use nn.Linear default
    # (uniform +-1/sqrt(fan_in)) — reproduced here deterministically.
    w1 = 0.1 * jax.random.normal(k1, (HIDDEN, N_STATES), jnp.float32)   # (out, in)
    b1 = jax.random.uniform(k2, (HIDDEN,), jnp.float32,
                            -1.0 / jnp.sqrt(N_STATES), 1.0 / jnp.sqrt(N_STATES))
    w2 = 0.1 * jax.random.normal(k3, (N_ACTIONS, HIDDEN), jnp.float32)  # (out, in)
    b2 = jax.random.uniform(k4, (N_ACTIONS,), jnp.float32,
                            -1.0 / jnp.sqrt(HIDDEN), 1.0 / jnp.sqrt(HIDDEN))
    return w1, b1, w2, b2


def reference_forward(x, w1, b1, w2, b2):
    h = jnp.maximum(x @ w1.T + b1, 0.0)
    return h @ w2.T + b2


if __name__ == "__main__":
    key = jax.random.PRNGKey(0)
    kx, kp_eval, kp_tgt, kx2 = jax.random.split(key, 4)

    # --- Two networks (eval + target, as in a DQN learn step), small batch ---
    B = 2
    x = jax.random.normal(kx, (B, N_STATES), jnp.float32)

    eval_params = init_params(kp_eval)
    tgt_params = init_params(kp_tgt)
    w_slabs = jnp.stack([pack_params(*eval_params),
                         pack_params(*tgt_params)], axis=0)  # (2, 136, 128)

    q_both = net_forward_multi(x, w_slabs)
    q_both = jax.block_until_ready(q_both)
    assert q_both.shape == (2, B, N_ACTIONS)

    ref_eval = reference_forward(x, *eval_params)
    ref_tgt = reference_forward(x, *tgt_params)
    assert jnp.allclose(q_both[0], ref_eval, atol=1e-5, rtol=1e-5)
    assert jnp.allclose(q_both[1], ref_tgt, atol=1e-5, rtol=1e-5)

    # --- Single-network path (choose_action style), slightly larger batch ---
    B2 = 32
    x2 = jax.random.normal(kx2, (B2, N_STATES), jnp.float32)
    q_single = jax.block_until_ready(net_forward(x2, w_slabs[0]))
    assert q_single.shape == (B2, N_ACTIONS)
    assert jnp.allclose(q_single, reference_forward(x2, *eval_params),
                        atol=1e-5, rtol=1e-5)

    print("KERNEL_OK")
</pallas_src>

<mosaic_0001>
module attributes {stable_mosaic.version = 11 : i64} {
  func.func @net_kernel(%arg0: i32, %arg1: i32, %arg2: memref<8x8xf32, #tpu.memory_space<vmem>>, %arg3: memref<1x136x128xf32, #tpu.memory_space<vmem>>, %arg4: memref<1x8x128xf32, #tpu.memory_space<vmem>>) attributes {dimension_semantics = [#tpu.dimension_semantics<parallel>, #tpu.dimension_semantics<parallel>], iteration_bounds = array<i64: 2, 1>, scalar_prefetch = 0 : i64, scratch_operands = 0 : i64, tpu.core_type = #tpu.core_type<tc>, window_params = [{transform_indices = @transform_0, window_bounds = array<i64: 8, 8>}, {transform_indices = @transform_1, window_bounds = array<i64: 1, 136, 128>}, {transform_indices = @transform_2, window_bounds = array<i64: 1, 8, 128>}]} {
    %c0 = arith.constant 0 : index
    %c0_0 = arith.constant 0 : index
    %0 = vector.load %arg2[%c0, %c0_0] : memref<8x8xf32, #tpu.memory_space<vmem>>, vector<8x8xf32>
    %c0_1 = arith.constant 0 : index
    %c0_2 = arith.constant 0 : index
    %c0_3 = arith.constant 0 : index
    %1 = vector.load %arg3[%c0_1, %c0_2, %c0_3] : memref<1x136x128xf32, #tpu.memory_space<vmem>>, vector<1x8x128xf32>
    %2 = vector.shape_cast %1 : vector<1x8x128xf32> to vector<8x128xf32>
    %c0_4 = arith.constant 0 : index
    %c8 = arith.constant 8 : index
    %c0_5 = arith.constant 0 : index
    %3 = vector.load %arg3[%c0_4, %c8, %c0_5] : memref<1x136x128xf32, #tpu.memory_space<vmem>>, vector<1x128x128xf32>
    %4 = vector.shape_cast %3 : vector<1x128x128xf32> to vector<128x128xf32>
    %cst = arith.constant dense<0.000000e+00> : vector<8x128xf32>
    %5 = tpu.matmul %0, %2, %cst {dimension_numbers = #tpu.dot_dimension_numbers<[1], [0], [0], [1], [0, 0, 1, 1], [], []>} : vector<8x8xf32>, vector<8x128xf32>, vector<8x128xf32> -> vector<8x128xf32>
    %cst_6 = arith.constant 0.000000e+00 : f32
    %6 = vector.broadcast %cst_6 : f32 to vector<8x128xf32>
    %7 = arith.maximumf %5, %6 : vector<8x128xf32>
    %cst_7 = arith.constant dense<0.000000e+00> : vector<8x128xf32>
    %8 = tpu.matmul %7, %4, %cst_7 {dimension_numbers = #tpu.dot_dimension_numbers<[1], [0], [0], [1], [0, 0, 1, 1], [], []>} : vector<8x128xf32>, vector<128x128xf32>, vector<8x128xf32> -> vector<8x128xf32>
    %c0_8 = arith.constant 0 : index
    %c0_9 = arith.constant 0 : index
    %c0_10 = arith.constant 0 : index
    %9 = vector.load %arg4[%c0_8, %c0_9, %c0_10] : memref<1x8x128xf32, #tpu.memory_space<vmem>>, vector<1x8x128xf32>
    %10 = vector.shape_cast %9 : vector<1x8x128xf32> to vector<8x128xf32>
    %11 = vector.shape_cast %8 : vector<8x128xf32> to vector<1x8x128xf32>
    tpu.vector_store %arg4[%c0_8, %c0_9, %c0_10], %11 {strides = array<i32>} : memref<1x8x128xf32, #tpu.memory_space<vmem>>, vector<1x8x128xf32>,
    return
  }
  func.func @transform_0(%arg0: i32, %arg1: i32) -> (i32, i32) {
    %c0_i32 = arith.constant 0 : i32
    %c0_i32_0 = arith.constant 0 : i32
    return %arg1, %c0_i32 : i32, i32
  }
  func.func @transform_1(%arg0: i32, %arg1: i32) -> (i32, i32, i32) {
    %c0_i32 = arith.constant 0 : i32
    %c0_i32_0 = arith.constant 0 : i32
    %c0_i32_1 = arith.constant 0 : i32
    return %arg0, %c0_i32, %c0_i32_0 : i32, i32, i32
  }
  func.func @transform_2(%arg0: i32, %arg1: i32) -> (i32, i32, i32) {
    %c0_i32 = arith.constant 0 : i32
    %c0_i32_0 = arith.constant 0 : i32
    return %arg0, %arg1, %c0_i32 : i32, i32, i32
  }
}

</mosaic_0001>

<bundles_post_ra>
// kernel: net_forward_multi.1
= control target key start
LH: loop header
LB: loop body
LE: loop exit
PB: predicated region body
PF: predicated region fallthrough
CT: control target
= control target key end

     0   :  { %7 = vsyncpa [#allocation3], 0  ;;  %s637_s0 = inlined_call_operand.vmem [shape: f32[8,8], index: 0, kind: input, shape index: {}]   ;;  %s638_s1 = inlined_call_operand.hbm [shape: f32[2,136,128], index: 1, kind: input, shape index: {}]   ;;  %s639_s2 = inlined_call_operand.vmem [shape: f32[2,8,128], index: 2, kind: output, shape index: {}]  }
   0x1   :  { %9 = vsyncpa [#allocation3 + $0x1], 0  ;;  %s533_s9 = smov 0   ;;  %s535_s10 = smov 0  }
   0x2   :  { %s537_s11 = smov 0   ;;  %s539_s12 = smov 0  }
   0x3   :  { %s541_s13 = smov 0   ;;  %s543_s14 = smov 0  }
   0x4 LB: > { %s363_s15 = sadd.s32 4294967295, %s514_s14   ;;  %s27_s16 = sadd.s32 1, %s510_s13  ;;  %s514_s14 = sphi %s543_s14, %s15_s14   ;;  %s510_s13 = sphi %s541_s13, %s645_s13   ;;  %s506_s12 = sphi %s539_s12, %s644_s12   ;;  %s502_s11 = sphi %s537_s11, %s643_s11   ;;  %s498_s10 = sphi %s535_s10, %s642_s10   ;;  %s494_s9 = sphi %s533_s9, %s641_s9  }
   0x5   : > { %p29_p0 = scmp.ge.s32.totalorder %s27_s16, 2  ;;  %s60_s17 = sadd.s32 1, %s502_s11 }
   0x6   : > { %p67_p1 = scmp.ne.s32.totalorder %s502_s11, %s498_s10  ;;  %p68_p2 = scmp.eq.s32.totalorder %s514_s14, 0 }
   0x7   : > { %s647_s16 = smov (%p29_p0, %s27_s16), 0  ;;  %p73_p4 = scmp.ne.s32.totalorder %s498_s10, %s494_s9 }
   0x8   : > { %p69_p3 = por %p68_p2, %p67_p1  ;;  %s57_s18 = ssub.s32 %s510_s13, %s647_s16 }
   0x9   : > { %p74_p5 = scmp.eq.s32.totalorder %s363_s15, 0  ;;  %p58_p6 = scmp.eq.s32.totalorder %s57_s18, 0 }
   0xa   : > { %p383_p8 = scmp.lt.s32.totalorder %s514_s14, 2  ;;  %s132_s21 = sand.u32 1, %s502_s11  }
   0xb   : > { %p572_p7 = por %p74_p5, %p73_p4  ;;  %s375_s22 = smul.u32 136, %s510_s13 }
   0xc   : > { %s578_s20 = scalar_select %p58_p6, %s502_s11, %s60_s17  }
   0xd   : > { %s374_s23 = smul.u32 136, %s132_s21  ;;  %s141_s26 = scalar_lea.hbm %s638_s1, %s375_s22 }
   0xe   : > { %p380_p9 = pnand %p383_p8, %p69_p3  ;;  %s142_s27 = sshll.u32 %s141_s26, 4  ;;  %s143_s27 = int_to_ptr.hbm [resolvable:$true] %s142_s27 }
   0xf   : > { %s136_s28 = scalar_lea.vmem [#allocation2], %s374_s23  ;;  %s133_s30 = scalar_lea.sflag [#allocation3], %s132_s21 }
  0x10   : > { %s144_s29 = sshll.u32 %s136_s28, 4  ;;  %s516_s3 = smov 128   ;;  %s145_s29 = int_to_ptr.vmem [resolvable:$true] %s144_s29 }
  0x11   : > { %s517_s4 = smov 8   ;;  %p369_p10 = scmp.ge.s32.totalorder %s514_s14, 1 }
  0x12   : > { %382 = dma.hbm_to_vmem [thread:$0]  (!%p380_p9), %s143_s27, 2176, %s145_s29, %s133_s30, %s516_s3, %s516_s3, %s517_s4  }
  0x13   : > { %p152_p11 = scmp.lt.s32.totalorder %s514_s14, 3 }
  0x15   : > { %p153_p12 = pnand %p369_p10, %p152_p11 }
  0x16   : > { %s158_s5 = sand.u32 (!%p153_p12), 1, %s498_s10  }
  0x17   : > { %156 = sbr.rel (%p153_p12) target bundleno = 286 (0x11e), region = 28  ;;  %s159_s7 = scalar_lea.sflag (!%p153_p12), [#allocation3], %s158_s5 }
  0x18   : > { %s376_s6 = smul.u32 (!%p153_p12), 136, %s158_s5 }
  0x1a   : > { %s588_s8 = scalar_lea.vmem (!%p153_p12), [#allocation2], %s376_s6 }
  0x1c   : > { %489 = dma.done.wait (%p572_p7), %s159_s7, 2176  }
  0x1d   : > { %491 = vsyncadd (%p572_p7), %s159_s7, 4294965120  ;;  %vm219_vm0 = vcmask 64512   ;;  %v202_v0 = vld [vmem:[%s588_s8] sm:$0xff]  ;;  %v217_v3 = vld [vmem:[%s588_s8 + $0x78] sm:$0xff]  ;;  %p194_p13 = scmp.lt.s32.totalorder %s506_s12, 1 }
  0x1e   : > { %v201_v1 = vld [vmem:[%s637_s0] sm:$0xff]  ;;  %238 = vmatpush.msra.mxu0 %v202_v0  ;;  %v216_v4 = vld [vmem:[%s588_s8 + $0x70] sm:$0xff]  ;;  %v215_v5 = vld [vmem:[%s588_s8 + $0x68] sm:$0xff] }
  0x1f   : > { %v218_v2 = vld [vmem:[%s588_s8 + $0x80] sm:$0xff]  ;;  %371 = vmatmul.msk.f32.vlgmr.msra.gmra.mxu0 %vm219_vm0, %v201_v1  ;;  %v213_v7 = vld [vmem:[%s588_s8 + $0x58] sm:$0xff]  ;;  %v212_v8 = vld [vmem:[%s588_s8 + $0x50] sm:$0xff]  ;;  %s649_s12 = smov (!%p194_p13, %s506_s12), 1 }
  0x20   : > { %244 = vmatpush.msra.mxu1 %v218_v2  ;;  %v214_v6 = vld [vmem:[%s588_s8 + $0x60] sm:$0xff]  ;;  %v211_v9 = vld [vmem:[%s588_s8 + $0x48] sm:$0xff]  ;;  %v209_v11 = vld [vmem:[%s588_s8 + $0x38] sm:$0xff]  ;;  %s370_s17 = sshll.u32 %s649_s12, 3 }
  0x21   : > { %v210_v10 = vld [vmem:[%s588_s8 + $0x40] sm:$0xff]  ;;  %v208_v12 = vld [vmem:[%s588_s8 + $0x30] sm:$0xff]  ;;  %v207_v13 = vld [vmem:[%s588_s8 + $0x28] sm:$0xff]  ;;  %s200_s21 = scalar_lea.vmem %s639_s2, %s370_s17 }
  0x22   : > { %245 = vmatpush.msra.mxu1 %v217_v3  ;;  %v206_v14 = vld [vmem:[%s588_s8 + $0x20] sm:$0xff]  ;;  %v205_v15 = vld [vmem:[%s588_s8 + $0x18] sm:$0xff]  ;;  %v204_v16 = vld [vmem:[%s588_s8 + $0x10] sm:$0xff] }
  0x23   : > { %v203_v17 = vld [vmem:[%s588_s8 + $0x8] sm:$0xff] }
  0x24   : > { %246 = vmatpush.msra.mxu1 %v216_v4 }
  0x26   : > { %247 = vmatpush.msra.mxu1 %v215_v5 }
  0x28   : > { %248 = vmatpush.msra.mxu1 %v214_v6 }
  0x2a   : > { %249 = vmatpush.msra.mxu1 %v213_v7 }
  0x2c   : > { %250 = vmatpush.msra.mxu1 %v212_v8 }
  0x2e   : > { %251 = vmatpush.msra.mxu1 %v211_v9 }
  0x30   : > { %252 = vmatpush.msra.mxu1 %v210_v10 }
  0x32   : > { %253 = vmatpush.msra.mxu1 %v209_v11 }
  0x34   : > { %254 = vmatpush.msra.mxu1 %v208_v12 }
  0x36   : > { %255 = vmatpush.msra.mxu1 %v207_v13 }
  0x38   : > { %256 = vmatpush.msra.mxu1 %v206_v14 }
  0x3a   : > { %257 = vmatpush.msra.mxu1 %v205_v15 }
  0x3c   : > { %258 = vmatpush.msra.mxu1 %v204_v16 }
  0x3e   : > { %259 = vmatpush.msra.mxu1 %v203_v17 }
  0x9c   : > { %v240_v18 = vpop.f32.mrf.mxu0 }
  0x9d   : > { %v243_v19 = vmax.f32 %v240_v18, 0.0 }
  0x9f   : > { %260 = vmatmul.f32.vlgmr.msra.gmra.mxu1 %v243_v19 }
 0x11c   : > { %v261_v20 = vpop.f32.mrf.mxu1 }
 0x11d   : > { %264 = vst [vmem:[%s200_s21] sm:$0xff] %v261_v20 }
 0x11e PF: > { %s15_s14 = sadd.s32 1, %s514_s14   ;;  %s641_s9 = smov %s498_s10 }
 0x11f   : > { %p12_p0 = scmp.ge.s32.totalorder %s15_s14, 4   ;;  %s642_s10 = smov %s502_s11 }
 0x120   : > { %s643_s11 = smov %s578_s20  ;;  %s644_s12 = smov %s510_s13 }
 0x121   : > { %s645_s13 = smov %s647_s16  ;;  %14 = sbr.rel (!%p12_p0) target bundleno = 4 (0x4), region = 71 }
 0x126   :  { %290 = vsyncpa [#allocation3], 1 }
 0x127   :  { %292 = vsyncpa [#allocation3 + $0x1], 1 }

</bundles_post_ra>
